<compile_context>
chip_gen: v6e
topology: v6e:2x2x1
jax: 0.10.0
libtpu: 0.0.40
codegen_flags: <defaults>
</compile_context>

<pallas_src>
import jax
import jax.numpy as jnp
from jax.experimental import pallas as pl
from jax.experimental.pallas import tpu as pltpu


def _planar_stack_kernel(b_ref, c_ref, w_ref, ut_ref, z_ref, zo_ref, ld_ref, t_ref):
    """One batch tile of the K-layer planar-flow composition.

    b_ref : (K,)    f32 SMEM   per-flow biases
    c_ref : (K, K)  f32 SMEM   C[k, j] = w_k . u_j   (diag = w_k . u_k)
    w_ref : (K, D)  f32 VMEM   flow weight vectors
    ut_ref: (D, K)  f32 VMEM   flow direction vectors, pre-transposed
    z_ref : (D, TB) f32 VMEM   input samples, batch on the lane axis
    zo_ref: (D, TB) f32 VMEM   transformed samples
    ld_ref: (1, TB) f32 VMEM   summed log|det J| per sample
    t_ref : (K, TB) f32 VMEM   scratch: per-layer tanh activations
    """
    K = w_ref.shape[0]
    z = z_ref[...]                                              # (D, TB)

    # All K feature reductions w_k . z0 in ONE MXU matmul (XLU stays idle).
    lin0 = jnp.dot(w_ref[...], z,
                   preferred_element_type=jnp.float32)          # (K, TB)

    # Serial part of the recurrence only touches (1, TB) rows:
    #   t_k = tanh(w_k.z0 + b_k + sum_{j<k} C[k, j] * t_j)
    # K is small and static -> unrolled.
    # TODO(synk): for large K switch to lax.fori_loop carrying state through
    # t_ref to bound vreg live ranges.
    prod_absdet = None
    for k in range(K):
        lin = lin0[k:k + 1, :] + b_ref[k]                       # (1, TB)
        for j in range(k):
            lin = lin + c_ref[k, j] * t_ref[j:j + 1, :]         # SMEM scalar * vec
        t = jnp.tanh(lin)                                       # EUP
        t_ref[k:k + 1, :] = t
        det = 1.0 + (1.0 - t * t) * c_ref[k, k]                 # c[k,k] = w_k.u_k
        absdet = jnp.abs(det)
        prod_absdet = absdet if prod_absdet is None else prod_absdet * absdet

    # z_out = z0 + U^T @ T : second MXU matmul; lane-dense (D, TB) store.
    zo_ref[...] = z + jnp.dot(ut_ref[...], t_ref[...],
                              preferred_element_type=jnp.float32)
    # Single log instead of K (product of |det_k|; for very large K keep a
    # running sum of logs instead to avoid underflow).
    ld_ref[...] = jnp.log(prod_absdet)


def _round_up(x, m):
    return ((x + m - 1) // m) * m


def simple_flow_model(z, u, w, b, *, block_b=512):
    """Pallas-backed SimpleFlowModel forward (K stacked planar flows).

    z: (B, D), u/w: (K, D), b: (K, 1) or (K,).
    Returns (z_out (B, D), log_det (B,)).
    """
    z = jnp.asarray(z, jnp.float32)
    u = jnp.asarray(u, jnp.float32)
    w = jnp.asarray(w, jnp.float32)
    B, D = z.shape
    K = u.shape[0]

    # Hoisted parameter reductions: computed ONCE in the wrapper (exact f32).
    C = jnp.sum(w[:, None, :] * u[None, :, :], axis=-1)         # (K, K)
    bvec = jnp.asarray(b, jnp.float32).reshape(K)               # (K,)
    uT = u.T                                                    # (D, K)

    # Batch on the lane axis; pad lanes to a multiple of the tile.
    zT = z.T                                                    # (D, B)
    TB = min(block_b, _round_up(B, 128))                        # lane tile
    Bp = _round_up(B, TB)
    if Bp != B:
        zT = jnp.pad(zT, ((0, 0), (0, Bp - B)))                 # zero-pad: safe (tanh(b))
    grid = (Bp // TB,)

    smem = pl.BlockSpec(memory_space=pltpu.MemorySpace.SMEM)
    zoT, ld = pl.pallas_call(
        _planar_stack_kernel,
        out_shape=(
            jax.ShapeDtypeStruct((D, Bp), jnp.float32),
            jax.ShapeDtypeStruct((1, Bp), jnp.float32),
        ),
        grid=grid,
        in_specs=[
            smem,                                               # b     (K,)
            smem,                                               # C     (K, K)
            pl.BlockSpec((K, D), lambda i: (0, 0)),             # W     (full block)
            pl.BlockSpec((D, K), lambda i: (0, 0)),             # U^T   (full block)
            pl.BlockSpec((D, TB), lambda i: (0, i)),            # z tile
        ],
        out_specs=(
            pl.BlockSpec((D, TB), lambda i: (0, i)),            # z_out tile
            pl.BlockSpec((1, TB), lambda i: (0, i)),            # log-det tile
        ),
        scratch_shapes=[pltpu.VMEM((K, TB), jnp.float32)],
        compiler_params=pltpu.CompilerParams(
            dimension_semantics=("parallel",)),                 # v7x: shard over 2 TCs
    )(bvec, C, w, uT, zT)

    # Back to the module's (B, D) / (B,) convention (callers that can keep the
    # (D, B) layout should, to avoid these two HBM transposes).
    return zoT[:, :B].T, ld[0, :B]


def _reference(z, u, w, b):
    """Pure-JAX sequential reference (mirrors the PyTorch composition)."""
    ld = jnp.zeros((z.shape[0],), jnp.float32)
    for k in range(u.shape[0]):
        lin = jnp.sum(z * w[k][None, :], axis=-1) + b[k, 0]
        t = jnp.tanh(lin)
        z = z + u[k][None, :] * t[:, None]
        wu = jnp.sum(w[k] * u[k])
        det = 1.0 + (1.0 - t * t) * wu
        ld = ld + jnp.log(jnp.abs(det))
    return z, ld


if __name__ == "__main__":
    B, D, K = 8, 32, 4   # batch=8, hidden=32, 4 stacked planar flows

    key = jax.random.PRNGKey(0)
    kz, ku, kw, kb = jax.random.split(key, 4)
    z = jax.random.normal(kz, (B, D), dtype=jnp.float32)
    u = 0.1 * jax.random.normal(ku, (K, D), dtype=jnp.float32)
    w = 0.1 * jax.random.normal(kw, (K, D), dtype=jnp.float32)
    b = 0.1 * jax.random.normal(kb, (K, 1), dtype=jnp.float32)

    z_out, ld = simple_flow_model(z, u, w, b)
    jax.block_until_ready((z_out, ld))

    z_ref, ld_ref = _reference(z, u, w, b)
    # Tolerance leaves headroom for the MXU's reduced default f32 contraction
    # precision (the restructured path runs the reductions on the MXU).
    assert jnp.allclose(z_out, z_ref, atol=5e-3, rtol=5e-3), (
        float(jnp.max(jnp.abs(z_out - z_ref))))
    assert jnp.allclose(ld, ld_ref, atol=5e-3, rtol=5e-3), (
        float(jnp.max(jnp.abs(ld - ld_ref))))

    print("KERNEL_OK")
</pallas_src>

<mosaic_0001>
module attributes {stable_mosaic.version = 11 : i64} {
  func.func @_planar_stack_kernel(%arg0: i32, %arg1: memref<4xf32, #tpu.memory_space<smem>>, %arg2: memref<4x4xf32, #tpu.memory_space<smem>>, %arg3: memref<4x32xf32, #tpu.memory_space<vmem>>, %arg4: memref<32x4xf32, #tpu.memory_space<vmem>>, %arg5: memref<32x128xf32, #tpu.memory_space<vmem>>, %arg6: memref<32x128xf32, #tpu.memory_space<vmem>>, %arg7: memref<1x128xf32, #tpu.memory_space<vmem>>, %arg8: memref<4x128xf32, #tpu.memory_space<vmem>>) attributes {dimension_semantics = [#tpu.dimension_semantics<parallel>], iteration_bounds = array<i64: 1>, scalar_prefetch = 0 : i64, scratch_operands = 1 : i64, tpu.core_type = #tpu.core_type<tc>, window_params = [{transform_indices = @transform_0, window_bounds = array<i64: 4>}, {transform_indices = @transform_1, window_bounds = array<i64: 4, 4>}, {pipeline_mode = #tpu.pipeline_mode<synchronous>, transform_indices = @transform_2, window_bounds = array<i64: 4, 32>}, {pipeline_mode = #tpu.pipeline_mode<synchronous>, transform_indices = @transform_3, window_bounds = array<i64: 32, 4>}, {transform_indices = @transform_4, window_bounds = array<i64: 32, 128>}, {transform_indices = @transform_5, window_bounds = array<i64: 32, 128>}, {transform_indices = @transform_6, window_bounds = array<i64: 1, 128>}]} {
    %c0 = arith.constant 0 : index
    %c0_0 = arith.constant 0 : index
    %0 = vector.load %arg5[%c0, %c0_0] : memref<32x128xf32, #tpu.memory_space<vmem>>, vector<32x128xf32>
    %c0_1 = arith.constant 0 : index
    %c0_2 = arith.constant 0 : index
    %1 = vector.load %arg3[%c0_1, %c0_2] : memref<4x32xf32, #tpu.memory_space<vmem>>, vector<4x32xf32>
    %cst = arith.constant dense<0.000000e+00> : vector<4x128xf32>
    %2 = tpu.matmul %1, %0, %cst {dimension_numbers = #tpu.dot_dimension_numbers<[1], [0], [0], [1], [0, 0, 1, 1], [], []>} : vector<4x32xf32>, vector<32x128xf32>, vector<4x128xf32> -> vector<4x128xf32>
    %3 = vector.extract_strided_slice %2 {offsets = [0, 0], sizes = [1, 128], strides = [1, 1]} : vector<4x128xf32> to vector<1x128xf32>
    %c0_3 = arith.constant 0 : index
    %4 = memref.load %arg1[%c0_3] : memref<4xf32, #tpu.memory_space<smem>>
    %5 = vector.broadcast %4 : f32 to vector<1x128xf32>
    %6 = arith.addf %3, %5 : vector<1x128xf32>
    %7 = math.tanh %6 : vector<1x128xf32>
    %c0_4 = arith.constant 0 : index
    %c0_5 = arith.constant 0 : index
    %8 = vector.load %arg8[%c0_4, %c0_5] : memref<4x128xf32, #tpu.memory_space<vmem>>, vector<1x128xf32>
    tpu.vector_store %arg8[%c0_4, %c0_5], %7 {strides = array<i32>} : memref<4x128xf32, #tpu.memory_space<vmem>>, vector<1x128xf32>,
    %9 = arith.mulf %7, %7 : vector<1x128xf32>
    %cst_6 = arith.constant 1.000000e+00 : f32
    %10 = vector.broadcast %cst_6 : f32 to vector<1x128xf32>
    %11 = arith.subf %10, %9 : vector<1x128xf32>
    %c0_7 = arith.constant 0 : index
    %c0_8 = arith.constant 0 : index
    %12 = memref.load %arg2[%c0_7, %c0_8] : memref<4x4xf32, #tpu.memory_space<smem>>
    %13 = vector.broadcast %12 : f32 to vector<1x128xf32>
    %14 = arith.mulf %11, %13 : vector<1x128xf32>
    %cst_9 = arith.constant 1.000000e+00 : f32
    %15 = vector.broadcast %cst_9 : f32 to vector<1x128xf32>
    %16 = arith.addf %15, %14 : vector<1x128xf32>
    %17 = math.absf %16 : vector<1x128xf32>
    %18 = vector.extract_strided_slice %2 {offsets = [1, 0], sizes = [1, 128], strides = [1, 1]} : vector<4x128xf32> to vector<1x128xf32>
    %c1 = arith.constant 1 : index
    %19 = memref.load %arg1[%c1] : memref<4xf32, #tpu.memory_space<smem>>
    %20 = vector.broadcast %19 : f32 to vector<1x128xf32>
    %21 = arith.addf %18, %20 : vector<1x128xf32>
    %c1_10 = arith.constant 1 : index
    %c0_11 = arith.constant 0 : index
    %22 = memref.load %arg2[%c1_10, %c0_11] : memref<4x4xf32, #tpu.memory_space<smem>>
    %c0_12 = arith.constant 0 : index
    %c0_13 = arith.constant 0 : index
    %23 = vector.load %arg8[%c0_12, %c0_13] : memref<4x128xf32, #tpu.memory_space<vmem>>, vector<1x128xf32>
    %24 = vector.broadcast %22 : f32 to vector<1x128xf32>
    %25 = arith.mulf %24, %23 : vector<1x128xf32>
    %26 = arith.addf %21, %25 : vector<1x128xf32>
    %27 = math.tanh %26 : vector<1x128xf32>
    %c1_14 = arith.constant 1 : index
    %c0_15 = arith.constant 0 : index
    %28 = vector.load %arg8[%c1_14, %c0_15] : memref<4x128xf32, #tpu.memory_space<vmem>>, vector<1x128xf32>
    tpu.vector_store %arg8[%c1_14, %c0_15], %27 {strides = array<i32>} : memref<4x128xf32, #tpu.memory_space<vmem>>, vector<1x128xf32>,
    %29 = arith.mulf %27, %27 : vector<1x128xf32>
    %cst_16 = arith.constant 1.000000e+00 : f32
    %30 = vector.broadcast %cst_16 : f32 to vector<1x128xf32>
    %31 = arith.subf %30, %29 : vector<1x128xf32>
    %c1_17 = arith.constant 1 : index
    %c1_18 = arith.constant 1 : index
    %32 = memref.load %arg2[%c1_17, %c1_18] : memref<4x4xf32, #tpu.memory_space<smem>>
    %33 = vector.broadcast %32 : f32 to vector<1x128xf32>
    %34 = arith.mulf %31, %33 : vector<1x128xf32>
    %cst_19 = arith.constant 1.000000e+00 : f32
    %35 = vector.broadcast %cst_19 : f32 to vector<1x128xf32>
    %36 = arith.addf %35, %34 : vector<1x128xf32>
    %37 = math.absf %36 : vector<1x128xf32>
    %38 = arith.mulf %17, %37 : vector<1x128xf32>
    %39 = vector.extract_strided_slice %2 {offsets = [2, 0], sizes = [1, 128], strides = [1, 1]} : vector<4x128xf32> to vector<1x128xf32>
    %c2 = arith.constant 2 : index
    %40 = memref.load %arg1[%c2] : memref<4xf32, #tpu.memory_space<smem>>
    %41 = vector.broadcast %40 : f32 to vector<1x128xf32>
    %42 = arith.addf %39, %41 : vector<1x128xf32>
    %c2_20 = arith.constant 2 : index
    %c0_21 = arith.constant 0 : index
    %43 = memref.load %arg2[%c2_20, %c0_21] : memref<4x4xf32, #tpu.memory_space<smem>>
    %c0_22 = arith.constant 0 : index
    %c0_23 = arith.constant 0 : index
    %44 = vector.load %arg8[%c0_22, %c0_23] : memref<4x128xf32, #tpu.memory_space<vmem>>, vector<1x128xf32>
    %45 = vector.broadcast %43 : f32 to vector<1x128xf32>
    %46 = arith.mulf %45, %44 : vector<1x128xf32>
    %47 = arith.addf %42, %46 : vector<1x128xf32>
    %c2_24 = arith.constant 2 : index
    %c1_25 = arith.constant 1 : index
    %48 = memref.load %arg2[%c2_24, %c1_25] : memref<4x4xf32, #tpu.memory_space<smem>>
    %c1_26 = arith.constant 1 : index
    %c0_27 = arith.constant 0 : index
    %49 = vector.load %arg8[%c1_26, %c0_27] : memref<4x128xf32, #tpu.memory_space<vmem>>, vector<1x128xf32>
    %50 = vector.broadcast %48 : f32 to vector<1x128xf32>
    %51 = arith.mulf %50, %49 : vector<1x128xf32>
    %52 = arith.addf %47, %51 : vector<1x128xf32>
    %53 = math.tanh %52 : vector<1x128xf32>
    %c2_28 = arith.constant 2 : index
    %c0_29 = arith.constant 0 : index
    %54 = vector.load %arg8[%c2_28, %c0_29] : memref<4x128xf32, #tpu.memory_space<vmem>>, vector<1x128xf32>
    tpu.vector_store %arg8[%c2_28, %c0_29], %53 {strides = array<i32>} : memref<4x128xf32, #tpu.memory_space<vmem>>, vector<1x128xf32>,
    %55 = arith.mulf %53, %53 : vector<1x128xf32>
    %cst_30 = arith.constant 1.000000e+00 : f32
    %56 = vector.broadcast %cst_30 : f32 to vector<1x128xf32>
    %57 = arith.subf %56, %55 : vector<1x128xf32>
    %c2_31 = arith.constant 2 : index
    %c2_32 = arith.constant 2 : index
    %58 = memref.load %arg2[%c2_31, %c2_32] : memref<4x4xf32, #tpu.memory_space<smem>>
    %59 = vector.broadcast %58 : f32 to vector<1x128xf32>
    %60 = arith.mulf %57, %59 : vector<1x128xf32>
    %cst_33 = arith.constant 1.000000e+00 : f32
    %61 = vector.broadcast %cst_33 : f32 to vector<1x128xf32>
    %62 = arith.addf %61, %60 : vector<1x128xf32>
    %63 = math.absf %62 : vector<1x128xf32>
    %64 = arith.mulf %38, %63 : vector<1x128xf32>
    %65 = vector.extract_strided_slice %2 {offsets = [3, 0], sizes = [1, 128], strides = [1, 1]} : vector<4x128xf32> to vector<1x128xf32>
    %c3 = arith.constant 3 : index
    %66 = memref.load %arg1[%c3] : memref<4xf32, #tpu.memory_space<smem>>
    %67 = vector.broadcast %66 : f32 to vector<1x128xf32>
    %68 = arith.addf %65, %67 : vector<1x128xf32>
    %c3_34 = arith.constant 3 : index
    %c0_35 = arith.constant 0 : index
    %69 = memref.load %arg2[%c3_34, %c0_35] : memref<4x4xf32, #tpu.memory_space<smem>>
    %c0_36 = arith.constant 0 : index
    %c0_37 = arith.constant 0 : index
    %70 = vector.load %arg8[%c0_36, %c0_37] : memref<4x128xf32, #tpu.memory_space<vmem>>, vector<1x128xf32>
    %71 = vector.broadcast %69 : f32 to vector<1x128xf32>
    %72 = arith.mulf %71, %70 : vector<1x128xf32>
    %73 = arith.addf %68, %72 : vector<1x128xf32>
    %c3_38 = arith.constant 3 : index
    %c1_39 = arith.constant 1 : index
    %74 = memref.load %arg2[%c3_38, %c1_39] : memref<4x4xf32, #tpu.memory_space<smem>>
    %c1_40 = arith.constant 1 : index
    %c0_41 = arith.constant 0 : index
    %75 = vector.load %arg8[%c1_40, %c0_41] : memref<4x128xf32, #tpu.memory_space<vmem>>, vector<1x128xf32>
    %76 = vector.broadcast %74 : f32 to vector<1x128xf32>
    %77 = arith.mulf %76, %75 : vector<1x128xf32>
    %78 = arith.addf %73, %77 : vector<1x128xf32>
    %c3_42 = arith.constant 3 : index
    %c2_43 = arith.constant 2 : index
    %79 = memref.load %arg2[%c3_42, %c2_43] : memref<4x4xf32, #tpu.memory_space<smem>>
    %c2_44 = arith.constant 2 : index
    %c0_45 = arith.constant 0 : index
    %80 = vector.load %arg8[%c2_44, %c0_45] : memref<4x128xf32, #tpu.memory_space<vmem>>, vector<1x128xf32>
    %81 = vector.broadcast %79 : f32 to vector<1x128xf32>
    %82 = arith.mulf %81, %80 : vector<1x128xf32>
    %83 = arith.addf %78, %82 : vector<1x128xf32>
    %84 = math.tanh %83 : vector<1x128xf32>
    %c3_46 = arith.constant 3 : index
    %c0_47 = arith.constant 0 : index
    %85 = vector.load %arg8[%c3_46, %c0_47] : memref<4x128xf32, #tpu.memory_space<vmem>>, vector<1x128xf32>
    tpu.vector_store %arg8[%c3_46, %c0_47], %84 {strides = array<i32>} : memref<4x128xf32, #tpu.memory_space<vmem>>, vector<1x128xf32>,
    %86 = arith.mulf %84, %84 : vector<1x128xf32>
    %cst_48 = arith.constant 1.000000e+00 : f32
    %87 = vector.broadcast %cst_48 : f32 to vector<1x128xf32>
    %88 = arith.subf %87, %86 : vector<1x128xf32>
    %c3_49 = arith.constant 3 : index
    %c3_50 = arith.constant 3 : index
    %89 = memref.load %arg2[%c3_49, %c3_50] : memref<4x4xf32, #tpu.memory_space<smem>>
    %90 = vector.broadcast %89 : f32 to vector<1x128xf32>
    %91 = arith.mulf %88, %90 : vector<1x128xf32>
    %cst_51 = arith.constant 1.000000e+00 : f32
    %92 = vector.broadcast %cst_51 : f32 to vector<1x128xf32>
    %93 = arith.addf %92, %91 : vector<1x128xf32>
    %94 = math.absf %93 : vector<1x128xf32>
    %95 = arith.mulf %64, %94 : vector<1x128xf32>
    %c0_52 = arith.constant 0 : index
    %c0_53 = arith.constant 0 : index
    %96 = vector.load %arg4[%c0_52, %c0_53] : memref<32x4xf32, #tpu.memory_space<vmem>>, vector<32x4xf32>
    %c0_54 = arith.constant 0 : index
    %c0_55 = arith.constant 0 : index
    %97 = vector.load %arg8[%c0_54, %c0_55] : memref<4x128xf32, #tpu.memory_space<vmem>>, vector<4x128xf32>
    %cst_56 = arith.constant dense<0.000000e+00> : vector<32x128xf32>
    %98 = tpu.matmul %96, %97, %cst_56 {dimension_numbers = #tpu.dot_dimension_numbers<[1], [0], [0], [1], [0, 0, 1, 1], [], []>} : vector<32x4xf32>, vector<4x128xf32>, vector<32x128xf32> -> vector<32x128xf32>
    %99 = arith.addf %0, %98 : vector<32x128xf32>
    %c0_57 = arith.constant 0 : index
    %c0_58 = arith.constant 0 : index
    %100 = vector.load %arg6[%c0_57, %c0_58] : memref<32x128xf32, #tpu.memory_space<vmem>>, vector<32x128xf32>
    tpu.vector_store %arg6[%c0_57, %c0_58], %99 {strides = array<i32>} : memref<32x128xf32, #tpu.memory_space<vmem>>, vector<32x128xf32>,
    %101 = math.log %95 : vector<1x128xf32>
    %c0_59 = arith.constant 0 : index
    %c0_60 = arith.constant 0 : index
    %102 = vector.load %arg7[%c0_59, %c0_60] : memref<1x128xf32, #tpu.memory_space<vmem>>, vector<1x128xf32>
    tpu.vector_store %arg7[%c0_59, %c0_60], %101 {strides = array<i32>} : memref<1x128xf32, #tpu.memory_space<vmem>>, vector<1x128xf32>,
    return
  }
  func.func @transform_0(%arg0: i32) -> i32 {
    %c0_i32 = arith.constant 0 : i32
    %c0_i32_0 = arith.constant 0 : i32
    return %c0_i32 : i32
  }
  func.func @transform_1(%arg0: i32) -> (i32, i32) {
    %c0_i32 = arith.constant 0 : i32
    %c0_i32_0 = arith.constant 0 : i32
    %c0_i32_1 = arith.constant 0 : i32
    return %c0_i32, %c0_i32_0 : i32, i32
  }
  func.func @transform_2(%arg0: i32) -> (i32, i32) {
    %c0_i32 = arith.constant 0 : i32
    %c0_i32_0 = arith.constant 0 : i32
    %c0_i32_1 = arith.constant 0 : i32
    return %c0_i32, %c0_i32_0 : i32, i32
  }
  func.func @transform_3(%arg0: i32) -> (i32, i32) {
    %c0_i32 = arith.constant 0 : i32
    %c0_i32_0 = arith.constant 0 : i32
    %c0_i32_1 = arith.constant 0 : i32
    return %c0_i32, %c0_i32_0 : i32, i32
  }
  func.func @transform_4(%arg0: i32) -> (i32, i32) {
    %c0_i32 = arith.constant 0 : i32
    %c0_i32_0 = arith.constant 0 : i32
    return %c0_i32, %arg0 : i32, i32
  }
  func.func @transform_5(%arg0: i32) -> (i32, i32) {
    %c0_i32 = arith.constant 0 : i32
    %c0_i32_0 = arith.constant 0 : i32
    return %c0_i32, %arg0 : i32, i32
  }
  func.func @transform_6(%arg0: i32) -> (i32, i32) {
    %c0_i32 = arith.constant 0 : i32
    %c0_i32_0 = arith.constant 0 : i32
    return %c0_i32, %arg0 : i32, i32
  }
}

</mosaic_0001>

<bundles_post_ra>
// kernel: tpu_custom_call.1
= control target key start
LH: loop header
LB: loop body
LE: loop exit
PB: predicated region body
PF: predicated region fallthrough
CT: control target
= control target key end

     0   :  { %12 = vsyncpa [#allocation5], 0  ;;  %s631_s0 = inlined_call_operand.vmem [shape: f32[4], index: 0, kind: input, shape index: {}]   ;;  %s632_s1 = inlined_call_operand.vmem [shape: f32[4,4], index: 1, kind: input, shape index: {}]   ;;  %s633_s2 = inlined_call_operand.vmem [shape: f32[4,32], index: 2, kind: input, shape index: {}]   ;;  %s634_s3 = inlined_call_operand.vmem [shape: f32[32,4], index: 3, kind: input, shape index: {}]   ;;  %s635_s4 = inlined_call_operand.vmem [shape: f32[32,128], index: 4, kind: input, shape index: {}]   ;;  %s636_s5 = inlined_call_operand.hbm [shape: f32[32,128], index: 5, kind: output, shape index: {0}]   ;;  %s637_s6 = inlined_call_operand.hbm [shape: f32[1,128], index: 6, kind: output, shape index: {1}]  }
   0x1   :  { %13 = vsyncpa [#allocation7], 0 }
   0x2   :  { %14 = vsyncpa [#allocation4], 0 }
   0x3   :  { %15 = vsyncpa [#allocation10], 0  ;;  %s22_s23 = sshll.u32 %s631_s0, 4  ;;  %s32_s26 = sshll.u32 %s632_s1, 4  ;;  %s23_s23 = int_to_ptr.vmem [resolvable:$true] %s22_s23  ;;  %s33_s26 = int_to_ptr.vmem [resolvable:$true] %s32_s26 }
   0x4   :  { %s451_s27 = scalar_lea.vmem %s23_s23, 16  ;;  %p456_p1 = scmp.lt.s32.totalorder %s23_s23, %s23_s23 }
   0x5   :  { %p452_p0 = scmp.ne.s32.totalorder %s23_s23, %s451_s27  ;;  %p457_p2 = scmp.lt.s32.totalorder %s451_s27, %s451_s27 }
   0x7   :  { %p458_p3 = por %p457_p2, %p456_p1 }
   0x9   :  { %p459_p4 = pnand %p458_p3, %p452_p0 }
   0xb   :  { %462 = shalt.err (!%p459_p4)
}
   0xc   :  { %s523_s28 = smov [#allocation3]   ;;  %s463_s29 = scalar_lea.vmem %s33_s26, 64 }
   0xd   :  { %25 = dma.vmem_to_smem %s23_s23, 16, %s523_s28, [#allocation5]  }
   0xe   :  { %p464_p5 = scmp.ne.s32.totalorder %s33_s26, %s463_s29  ;;  %p468_p6 = scmp.lt.s32.totalorder %s33_s26, %s33_s26 }
   0xf   :  { %p469_p7 = scmp.lt.s32.totalorder %s463_s29, %s463_s29 }
  0x11   :  { %p470_p8 = por %p469_p7, %p468_p6 }
  0x13   :  { %p471_p9 = pnand %p470_p8, %p464_p5 }
  0x15   :  { %474 = shalt.err (!%p471_p9)
}
  0x16   :  { %s524_s0 = smov [#allocation6]  }
  0x17   :  { %35 = dma.vmem_to_smem %s33_s26, 64, %s524_s0, [#allocation7]  }
  0x18   :  { %515 = dma.done.wait [#allocation5], 16  }
  0x19   :  { %516 = vsyncadd [#allocation5], 4294967280 }
  0x1a   :  { %517 = dma.done.wait [#allocation7], 64  }
  0x1b   :  { %518 = vsyncadd [#allocation7], 4294967232 }
  0x1c   :  { %48 = sfence }
  0x1d   :  { %v575_v0 = vld [vmem:[%s635_s4 + $0x18] sm:$0xff]  ;;  %v525_v1 = vmov 0.0   ;;  %v580_v2 = vld [vmem:[%s635_s4 + $0x10] sm:$0xff]  ;;  %vm526_vm0 = vmmov 0   ;;  %v586_v3 = vld [vmem:[%s635_s4 + $0x8] sm:$0xff]  ;;  %vm54_vm1 = vcmask 261120  }
  0x1e   :  { %414 = vmatprep.subr.mxu0 %v525_v1  ;;  %422 = vmatprep.mubr.msk.f32.mxu0 %vm526_vm0, %v525_v1  ;;  %v592_v4 = vld [vmem:[%s635_s4] sm:$0xff]  ;;  %vm241_vm2 = vcmask 31744   ;;  %s128_s4 = sld [smem:[#allocation3]]  ;;  %vm254_vm3 = vcmask 1043456   ;;  %s527_s9 = smov [#allocation9]  }
  0x1f   :  { %415 = vmatpush3.msra.mxu0 %v575_v0  ;;  %v53_v5 = vld [vmem:[%s633_s2] sm:$0xf]  ;;  %s388_s2 = sld [smem:[#allocation6 + $0x80]]  ;;  %s372_s10 = sshll.u32 %s527_s9, 4  ;;  %s373_s10 = int_to_ptr.vmem [resolvable:$true] %s372_s10 }
  0x20   :  { %416 = vmatprep.subr.mxu0 %v525_v1  ;;  %v236_v6 = vld [vmem:[%s634_s3] sm:$0xff]  ;;  %s387_s17 = sld [smem:[#allocation3 + $0x1]]  ;;  %s475_s11 = scalar_lea.vmem %s373_s10, 16 }
  0x21   :  { %417 = vmatpush3.msra.mxu0 %v580_v2  ;;  %427 = vmatprep.mubr.msk.f32.mxu1 %vm241_vm2, %v236_v6  ;;  %s135_s18 = sld [smem:[#allocation6]]  ;;  %p476_p10 = scmp.ne.s32.totalorder %s373_s10, %s475_s11 }
  0x22   :  { %418 = vmatprep.subr.mxu0 %v525_v1  ;;  %s391_s19 = sld [smem:[#allocation6 + $0x100]]  ;;  %s479_s12 = scalar_lea.vmem %s373_s10, 32 }
  0x23   :  { %419 = vmatpush3.msra.mxu0 %v586_v3  ;;  %s389_s20 = sld [smem:[#allocation6 + $0x81]]  ;;  %p480_p11 = scmp.lt.s32.totalorder %s373_s10, %s373_s10 }
  0x24   :  { %420 = vmatprep.subr.mxu0 %v525_v1  ;;  %v129_v7 = vstv %s128_s4  ;;  %s390_s21 = sld [smem:[#allocation3 + $0x2]]  ;;  %p481_p12 = scmp.lt.s32.totalorder %s479_s12, %s475_s11 }
  0x25   :  { %421 = vmatpush3.msra.mxu0 %v592_v4  ;;  %v145_v12 = vstv %s388_s2  ;;  %s392_s22 = sld [smem:[#allocation6 + $0x101]] }
  0x26   :  { %423 = vmatmul.mubr.msk.f32.vlgmr.msra.gmra.mxu0 %vm54_vm1, %v53_v5  ;;  %v141_v13 = vstv %s387_s17  ;;  %s395_s23 = sld [smem:[#allocation6 + $0x180]]  ;;  %p482_p13 = por %p481_p12, %p480_p11 }
  0x27   :  { %v136_v24 = vstv %s135_s18  ;;  %s396_s24 = sld [smem:[#allocation6 + $0x181]] }
  0x28   :  { %v169_v23 = vstv %s391_s19  ;;  %s394_s25 = sld [smem:[#allocation3 + $0x3]]  ;;  %p483_p0 = pnand %p482_p13, %p476_p10 }
  0x29   :  { %v156_v26 = vstv %s389_s20  ;;  %s397_s26 = sld [smem:[#allocation6 + $0x182]] }
  0x2a   :  { %v165_v31 = vstv %s390_s21  ;;  %s393_s27 = sld [smem:[#allocation6 + $0x102]] }
  0x2b   :  { %v177_v32 = vstv %s392_s22  ;;  %s398_s28 = sld [smem:[#allocation6 + $0x183]] }
  0x2c   :  { %v201_v47 = vstv %s395_s23 }
  0x2d   :  { %v209_v50 = vstv %s396_s24 }
  0x2e   :  { %v197_v53 = vstv %s394_s25 }
  0x2f   :  { %v217_v55 = vstv %s397_s26 }
  0x30   :  { %v188_v6 = vstv %s393_s27 }
  0xe6   :  { %v603_v8 = vpop.f32.mrf.mxu0 }
  0xe7   :  { %v130_v9 = vadd.f32 %v129_v7, %v603_v8  ;;  %v142_v16 = vadd.f32 %v141_v13, %v603_v8  ;;  %v166_v37 = vadd.f32 %v165_v31, %v603_v8  ;;  %v198_v56 = vadd.f32 %v197_v53, %v603_v8 }
  0xe8   :  { %v424_v10 = vpop.f32.mrf.mxu0 }
  0xe9   :  { %441 = vtanh.f32 %v130_v9 }
  0xf6   :  { %v442_v11 = vpop.eup %441 }
  0xf7   :  { %132 = vst [vmem:[#allocation2] sm:$0x1] %v442_v11  ;;  %v133_v19 = vmul.f32 %v442_v11, %v442_v11 }
  0xf9   :  { %v134_v20 = vsub.f32 1.0, %v133_v19  ;;  %v238_v19 = vld [vmem:[%s634_s3 + $0x10] sm:$0xff] }
  0xfb   :  { %v137_v28 = vmul.f32 %v136_v24, %v134_v20 }
  0xfd   :  { %v138_v34 = vadd.f32 1.0, %v137_v28 }
  0xfe   :  { %v144_v14 = vld [vmem:[#allocation2] sm:$0x1] }
  0xff   :  { %v146_v15 = vmul.f32 %v145_v12, %v144_v14  ;;  %v168_v22 = vld [vmem:[#allocation2] sm:$0x1]  ;;  %v139_v42 = vand.u32 2147483647, %v138_v34  ;;  %v228_v12 = vstv %s398_s28 }
 0x100   :  { %v170_v27 = vmul.f32 %v169_v23, %v168_v22  ;;  %v200_v46 = vld [vmem:[#allocation2] sm:$0x1]  ;;  %v239_v23 = vld [vmem:[%s634_s3 + $0x18] sm:$0xff] }
 0x101   :  { %v148_v17 = vrot.slane %v146_v15, 7  ;;  %v202_v51 = vmul.f32 %v201_v47, %v200_v46 }
 0x102   :  { %v172_v33 = vrot.slane %v170_v27, 6 }
 0x103   :  { %v150_v18 = vadd.f32 %v148_v17, %v142_v16  ;;  %v204_v54 = vrot.slane %v202_v51, 5 }
 0x104   :  { %v174_v40 = vadd.f32 %v172_v33, %v166_v37 }
 0x105   :  { %443 = vtanh.f32 %v150_v18  ;;  %v206_v59 = vadd.f32 %v204_v54, %v198_v56  ;;  %v237_v18 = vld [vmem:[%s634_s3 + $0x8] sm:$0xff] }
 0x112   :  { %v444_v21 = vpop.eup %443 }
 0x113   :  { %152 = vst [vmem:[#allocation2] sm:$0x2] %v444_v21  ;;  %v153_v25 = vmul.f32 %v444_v21, %v444_v21 }
 0x115   :  { %v154_v29 = vsub.f32 1.0, %v153_v25 }
 0x117   :  { %v157_v30 = vmul.f32 %v156_v26, %v154_v29 }
 0x119   :  { %v158_v35 = vadd.f32 1.0, %v157_v30 }
 0x11a   :  { %v176_v36 = vld [vmem:[#allocation2 + $0x1] sm:$0x1] }
 0x11b   :  { %v178_v38 = vmul.f32 %v177_v32, %v176_v36  ;;  %v159_v39 = vand.u32 2147483647, %v158_v35  ;;  %v208_v49 = vld [vmem:[#allocation2 + $0x1] sm:$0x1] }
 0x11c   :  { %v210_v52 = vmul.f32 %v209_v50, %v208_v49 }
 0x11d   :  { %v180_v41 = vrot.slane %v178_v38, 6  ;;  %v161_v43 = vrot.slane %v159_v39, 1 }
 0x11e   :  { %v212_v57 = vrot.slane %v210_v52, 5 }
 0x11f   :  { %v182_v44 = vadd.f32 %v180_v41, %v174_v40  ;;  %v163_v45 = vmul.f32 %v161_v43, %v139_v42 }
 0x120   :  { %v214_v61 = vadd.f32 %v212_v57, %v206_v59 }
 0x121   :  { %445 = vtanh.f32 %v182_v44 }
 0x12e   :  { %v446_v48 = vpop.eup %445 }
 0x12f   :  { %184 = vst [vmem:[#allocation2] sm:$0x4] %v446_v48  ;;  %v185_v1 = vmul.f32 %v446_v48, %v446_v48 }
 0x131   :  { %v186_v5 = vsub.f32 1.0, %v185_v1 }
 0x133   :  { %v189_v7 = vmul.f32 %v188_v6, %v186_v5 }
 0x135   :  { %v190_v9 = vadd.f32 1.0, %v189_v7 }
 0x136   :  { %v216_v58 = vld [vmem:[#allocation2 + $0x2] sm:$0x1] }
 0x137   :  { %v218_v60 = vmul.f32 %v217_v55, %v216_v58  ;;  %v191_v8 = vand.u32 2147483647, %v190_v9 }
 0x139   :  { %v220_v62 = vrot.slane %v218_v60, 5  ;;  %v193_v15 = vrot.slane %v191_v8, 2 }
 0x13b   :  { %v222_v63 = vadd.f32 %v220_v62, %v214_v61  ;;  %v195_v21 = vmul.f32 %v193_v15, %v163_v45 }
 0x13d   :  { %447 = vtanh.f32 %v222_v63 }
 0x14a   :  { %v448_v10 = vpop.eup %447 }
 0x14b   :  { %224 = vst [vmem:[#allocation2] sm:$0x8] %v448_v10  ;;  %v225_v11 = vmul.f32 %v448_v10, %v448_v10 }
 0x14d   :  { %v226_v13 = vsub.f32 1.0, %v225_v11 }
 0x14f   :  { %v229_v14 = vmul.f32 %v228_v12, %v226_v13 }
 0x151   :  { %v230_v16 = vadd.f32 1.0, %v229_v14 }
 0x152   :  { %v240_v17 = vld [vmem:[#allocation2] sm:$0xf] }
 0x153   :  { %425 = vmatprep.subr.msk.mxu1 %vm254_vm3, %v240_v17  ;;  %v231_v20 = vand.u32 2147483647, %v230_v16 }
 0x154   :  { %426 = vmatpush3.msk.msra.mxu1 %vm254_vm3, %v240_v17 }
 0x155   :  { %428 = vmatmul.mubr.msk.f32.vlgmr.msra.gmra.mxu1 %vm241_vm2, %v237_v18  ;;  %v233_v22 = vrot.slane %v231_v20, 3 }
 0x156   :  { %430 = vmatprep.mubr.msk.f32.mxu1 %vm241_vm2, %v238_v19 }
 0x157   :  { %v235_v24 = vmul.f32 %v233_v22, %v195_v21 }
 0x159   :  { %431 = vmatmul.mubr.msk.f32.gmra.mxu1 %vm241_vm2, %v239_v23  ;;  %449 = vlog2.f32 %v235_v24 }
 0x166   :  { %v450_v25 = vpop.eup %449 }
 0x167   :  { %v352_v26 = vmul.f32 0.6931472, %v450_v25 }
 0x169   :  { %353 = vst [vmem:[#allocation9] sm:$0x1] %v352_v26 }
 0x16a   :  { %486 = shalt.err (!%p483_p0)
}
 0x16b   :  { %375 = dma.vmem_to_hbm [thread:$0]  %s373_s10, 16, %s637_s6, [#allocation10]  }
 0x16c   :  { %s528_s14 = smov [#allocation8]  }
 0x16d   :  { %s359_s15 = sshll.u32 %s528_s14, 4  ;;  %s360_s15 = int_to_ptr.vmem [resolvable:$true] %s359_s15 }
 0x16e   :  { %s495_s6 = scalar_lea.vmem %s360_s15, 512  ;;  %p500_p2 = scmp.lt.s32.totalorder %s360_s15, %s360_s15 }
 0x16f   :  { %p496_p1 = scmp.ne.s32.totalorder %s360_s15, %s495_s6  ;;  %p501_p3 = scmp.lt.s32.totalorder %s495_s6, %s495_s6 }
 0x171   :  { %p502_p4 = por %p501_p3, %p500_p2 }
 0x173   :  { %p503_p5 = pnand %p502_p4, %p496_p1 }
 0x215   :  { %v429_v27 = vpop.f32.mrf.mxu1 }
 0x216   :  { %v344_v28 = vadd.f32 %v429_v27, %v586_v3 }
 0x217   :  { %v324_v29 = vpop.f32.mrf.mxu1 }
 0x218   :  { %348 = vst [vmem:[#allocation8 + $0x8] sm:$0xff] %v344_v28  ;;  %v343_v30 = vadd.f32 %v324_v29, %v592_v4 }
 0x219   :  { %v432_v31 = vpop.f32.mrf.mxu1 }
 0x21a   :  { %347 = vst [vmem:[#allocation8] sm:$0xff] %v343_v30  ;;  %v346_v32 = vadd.f32 %v432_v31, %v575_v0 }
 0x21b   :  { %v334_v33 = vpop.f32.mrf.mxu1 }
 0x21c   :  { %350 = vst [vmem:[#allocation8 + $0x18] sm:$0xff] %v346_v32  ;;  %v345_v34 = vadd.f32 %v334_v33, %v580_v2 }
 0x21e   :  { %349 = vst [vmem:[#allocation8 + $0x10] sm:$0xff] %v345_v34 }
 0x21f   :  { %506 = shalt.err (!%p503_p5)
}
 0x220   :  { %s529_s16 = smov 128   ;;  %s530_s4 = smov 8  }
 0x221   :  { %365 = dma.vmem_to_hbm [thread:$0]  %s360_s15, 512, %s636_s5, [#allocation4], %s529_s16, %s529_s16, %s530_s4  }
 0x222   :  { %519 = dma.done.wait [#allocation4], 512  }
 0x223   :  { %520 = vsyncadd [#allocation4], 4294966784 }
 0x224   :  { %521 = dma.done.wait [#allocation10], 16  }
 0x225   :  { %522 = vsyncadd [#allocation10], 4294967280 }
 0x226   :  { %382 = vsyncpa [#allocation4], 1 }
 0x227   :  { %383 = vsyncpa [#allocation10], 1 }
 0x228   :  { %384 = vsyncpa [#allocation5], 1 }
 0x229   :  { %385 = vsyncpa [#allocation7], 1 }

</bundles_post_ra>
